<compile_context>
chip_gen: v5e
topology: v5e:2x2
jax: 0.10.0
libtpu: 0.0.40
codegen_flags: <defaults>
</compile_context>

<pallas_src>
import jax
import jax.numpy as jnp
from jax.experimental import pallas as pl
from jax.experimental.pallas import tpu as pltpu


# Contract the last dim of both operands: out[i, j] = sum_f lhs[i, f] * rhs[j, f]
_NT_DIMS = (((1,), (1,)), ((), ()))

_COMPILER_PARAMS = pltpu.CompilerParams(
    dimension_semantics=("parallel",),
    vmem_limit_bytes=48 * 1024 * 1024,
)


def _round_up(a, m):
    return ((a + m - 1) // m) * m


def _pick_rows(n_rows, real_row_bytes, vmem_row_bytes,
               payload_target=2 << 20, vmem_budget=24 << 20):
    """Rows (output lanes) per grid step: ~2 MiB of real payload, VMEM-safe."""
    tn = payload_target // max(real_row_bytes, 1)
    tn = min(tn, vmem_budget // max(vmem_row_bytes, 1))
    tn = max(128, (tn // 128) * 128)
    if n_rows > 256:
        # at least 2 steps so the "parallel" axis can split across v7x's 2 TCs
        tn = min(tn, _round_up(pl.cdiv(n_rows, 2), 128))
        g = pl.cdiv(n_rows, tn)
        if g > 2 and g % 2 == 1:  # prefer an even step count on v7x
            t2 = _round_up(pl.cdiv(n_rows, g + 1), 128)
            if t2 >= 128 and pl.cdiv(n_rows, t2) % 2 == 0:
                tn = t2
    if n_rows <= tn:
        return n_rows, 1          # single block == full leading dim (always legal)
    return tn, pl.cdiv(n_rows, tn)


def _make_folded_kernel(L, E, F):
    """One MXU matmul per tile (linear + first + second all folded), VPU epilogue.

    L packed rows per 128-lane row (L == 1 means no packing).
      x_ref: (tn, L*F)            streamed, lane-dense
      w_ref: ((1+E+F)*L, L*F)     block-diagonal [w^T; v^T; diag(sqrt(s))], resident
      b_ref: (1, 1)               bias scalar in SMEM
      o_ref: (1, L, tn)           lane-dense output slab; o[0, l, p] is row p*L + l
    """
    def kernel(x_ref, w_ref, b_ref, o_ref):
        # y[r*L + l, p] = sum_f A_aug[r, f] * x[p*L + l, f]
        y = jax.lax.dot_general(w_ref[...], x_ref[...], _NT_DIMS,
                                preferred_element_type=jnp.float32)
        logit = y[0:L] + b_ref[0, 0]                       # linear term + bias
        if L == 1:
            logit = logit + jnp.sum(jnp.square(y[1:1 + E]), axis=0, keepdims=True)
            logit = logit - jnp.sum(jnp.square(y[1 + E:1 + E + F]), axis=0, keepdims=True)
        else:
            for e in range(E):                             # first term
                t = y[(1 + e) * L:(2 + e) * L]
                logit = logit + t * t
            for f in range(F):                             # second term (sqrt fold)
                t = y[(1 + E + f) * L:(2 + E + f) * L]
                logit = logit - t * t
        o_ref[0] = jax.nn.sigmoid(logit).astype(o_ref.dtype)

    return kernel


def _two_dot_kernel(x_ref, a_ref, s_ref, b_ref, o_ref):
    """Fallback for very large F (1+E+F > 256): A = [w^T; v^T], s = rowsum(v^2)."""
    x = x_ref[...]
    y = jax.lax.dot_general(a_ref[...], x, _NT_DIMS, preferred_element_type=jnp.float32)
    lin = y[0:1, :]
    xv = y[1:, :]
    first = jnp.sum(xv * xv, axis=0, keepdims=True)
    second = jax.lax.dot_general(s_ref[...], x * x, _NT_DIMS,
                                 preferred_element_type=jnp.float32)
    o_ref[0] = jax.nn.sigmoid(lin + b_ref[0, 0] + first - second).astype(o_ref.dtype)


def _fm_forward_folded(x, a_aug, b_arr, N, F, E, L):
    R = 1 + E + F
    itemsize = jnp.dtype(x.dtype).itemsize

    # Pad only if needed for the packing reshape (and keep >= 8 output lanes).
    n_pad = _round_up(N, L)
    if n_pad < 8 * L:
        n_pad = 8 * L
    if n_pad != N:
        x = jnp.pad(x, ((0, n_pad - N), (0, 0)))
    n_rows = x.shape[0] // L
    xp = x.reshape(n_rows, L * F)          # zero-copy re-view: lane-dense rows

    # Block-diagonal expansion: W[r*L + l, l*F + f] = A_aug[r, f]
    eye = jnp.eye(L, dtype=jnp.float32)
    w_bd = (a_aug[:, None, None, :] * eye[None, :, :, None]).reshape(R * L, L * F)

    lane_w = L * F
    # per-row VMEM: double-buffered x tile + y column + small epilogue temps
    vmem_row = 2 * _round_up(lane_w, 128) * itemsize + (R * L + 8 * L) * 4
    tn, G = _pick_rows(n_rows, lane_w * itemsize, vmem_row)

    out = pl.pallas_call(
        _make_folded_kernel(L, E, F),
        out_shape=jax.ShapeDtypeStruct((G, L, tn), jnp.float32),
        grid_spec=pltpu.PrefetchScalarGridSpec(
            num_scalar_prefetch=0,
            grid=(G,),
            in_specs=[
                pl.BlockSpec((tn, lane_w), lambda i: (i, 0)),      # x rows (streamed)
                pl.BlockSpec((R * L, lane_w), lambda i: (0, 0)),   # weights (resident)
                pl.BlockSpec(memory_space=pltpu.MemorySpace.SMEM),  # bias scalar
            ],
            out_specs=pl.BlockSpec((1, L, tn), lambda i: (i, 0, 0)),
        ),
        compiler_params=_COMPILER_PARAMS,
    )(xp, w_bd, b_arr)

    # out[i, l, p] is the prediction for input row (i*tn + p)*L + l.
    return out.transpose(0, 2, 1).reshape(-1, 1)[:N]


def _fm_forward_two_dot(x, a_mat, s_row, b_arr, N, F, E):
    itemsize = jnp.dtype(x.dtype).itemsize
    if N < 8:
        x = jnp.pad(x, ((0, 8 - N), (0, 0)))
    n_rows = x.shape[0]
    # per-row VMEM: 2 x buffers + x^2 temp (all lane-padded) + y column
    vmem_row = 3 * _round_up(F, 128) * itemsize + (1 + E + 8) * 4
    tn, G = _pick_rows(n_rows, F * itemsize, vmem_row)

    out = pl.pallas_call(
        _two_dot_kernel,
        out_shape=jax.ShapeDtypeStruct((G, 1, tn), jnp.float32),
        grid_spec=pltpu.PrefetchScalarGridSpec(
            num_scalar_prefetch=0,
            grid=(G,),
            in_specs=[
                pl.BlockSpec((tn, F), lambda i: (i, 0)),            # x rows (streamed)
                pl.BlockSpec((1 + E, F), lambda i: (0, 0)),         # [w^T; v^T] (resident)
                pl.BlockSpec((1, F), lambda i: (0, 0)),             # rowsum(v^2) (resident)
                pl.BlockSpec(memory_space=pltpu.MemorySpace.SMEM),  # bias scalar
            ],
            out_specs=pl.BlockSpec((1, 1, tn), lambda i: (i, 0, 0)),
        ),
        compiler_params=_COMPILER_PARAMS,
    )(x, a_mat, s_row, b_arr)

    return out.transpose(0, 2, 1).reshape(-1, 1)[:N]


def fm_forward(x, w, b, v):
    """FM forward. x: (N, F), w: (F, 1), b: (1, 1) or scalar, v: (F, E) -> (N, 1) f32."""
    N, F = x.shape
    E = v.shape[1]
    R = 1 + E + F

    w_col = jnp.asarray(w, jnp.float32).reshape(F, 1)
    v32 = jnp.asarray(v, jnp.float32)
    b_arr = jnp.asarray(b, jnp.float32).reshape(1, 1)
    s = jnp.sum(v32 * v32, axis=1)                         # (F,) rowsum(v^2) >= 0

    L = 128 // F if F <= 64 else 1                         # rows packed per 128-lane row
    if L * R > 2048:                                       # keep W_bd / y modest
        L = 1

    if L >= 2 or R <= 256:
        # Fold linear + first + second into one matmul:
        #   A_aug rows = [w^T ; v^T ; diag(sqrt(rowsum(v^2)))]   (valid since s >= 0)
        a_aug = jnp.concatenate([w_col.T, v32.T, jnp.diag(jnp.sqrt(s))], axis=0)  # (R, F)
        return _fm_forward_folded(x, a_aug, b_arr, N, F, E, L)

    # Very large F: a (F, F) diag block would dominate VMEM / MXU work -> two dots.
    a_mat = jnp.concatenate([w_col.T, v32.T], axis=0)      # (1+E, F)
    return _fm_forward_two_dot(x, a_mat, s[None, :], b_arr, N, F, E)


def fm_reference(x, w, b, v):
    lin = x @ w + jnp.asarray(b, x.dtype).reshape(1, 1)    # (N, 1)
    first = jnp.sum((x @ v) ** 2, axis=1)                  # (N,)
    second = jnp.sum((x ** 2) @ (v ** 2), axis=1)          # (N,)
    return jax.nn.sigmoid(lin[:, 0] + first - second).reshape(-1, 1)


def _make_inputs(key, num_item, field_dim, embed_dim):
    kx, kw, kb, kv = jax.random.split(key, 4)
    x = jax.random.normal(kx, (num_item, field_dim), dtype=jnp.float32)
    # nn.Linear(field_dim, 1): weight/bias ~ U(-1/sqrt(F), 1/sqrt(F))
    bound = 1.0 / (field_dim ** 0.5)
    w = jax.random.uniform(kw, (field_dim, 1), jnp.float32, -bound, bound)
    b = jax.random.uniform(kb, (1, 1), jnp.float32, -bound, bound)
    # xavier_normal_ for v
    std = (2.0 / (field_dim + embed_dim)) ** 0.5
    v = std * jax.random.normal(kv, (field_dim, embed_dim), dtype=jnp.float32)
    return x, w, b, v


if __name__ == "__main__":
    key = jax.random.PRNGKey(0)
    cases = [
        (16, 8, 4),     # module-sized small shapes: packed path, single block
        (1000, 10, 6),  # L*F < 128 and N % L != 0 (small pad-to-L), single block
        (5000, 8, 4),   # packed path, 2 grid steps + partial last block
        (300, 200, 8),  # F > 64: unpacked folded path, 2 steps + partial block
        (200, 300, 4),  # 1+E+F > 256: two-dot fallback path
    ]
    keys = jax.random.split(key, len(cases))
    for k, (n, f, e) in zip(keys, cases):
        x, w, b, v = _make_inputs(k, n, f, e)
        out = jax.block_until_ready(fm_forward(x, w, b, v))
        ref = fm_reference(x, w, b, v)
        assert out.shape == (n, 1), (out.shape, n)
        assert jnp.allclose(out, ref, atol=2e-4, rtol=2e-4), \
            f"mismatch vs reference for (N={n}, F={f}, E={e})"
    print("KERNEL_OK")
</pallas_src>

<mosaic_0001>
module attributes {stable_mosaic.version = 11 : i64} {
  func.func @kernel(%arg0: i32, %arg1: memref<8x128xf32, #tpu.memory_space<vmem>>, %arg2: memref<208x128xf32, #tpu.memory_space<vmem>>, %arg3: memref<1x1xf32, #tpu.memory_space<smem>>, %arg4: memref<1x16x8xf32, #tpu.memory_space<vmem>>) attributes {dimension_semantics = [#tpu.dimension_semantics<parallel>], iteration_bounds = array<i64: 1>, scalar_prefetch = 0 : i64, scratch_operands = 0 : i64, tpu.core_type = #tpu.core_type<tc>, window_params = [{transform_indices = @transform_0, window_bounds = array<i64: 8, 128>}, {pipeline_mode = #tpu.pipeline_mode<synchronous>, transform_indices = @transform_1, window_bounds = array<i64: 208, 128>}, {transform_indices = @transform_2, window_bounds = array<i64: 1, 1>}, {transform_indices = @transform_3, window_bounds = array<i64: 1, 16, 8>}]} {
    %c0 = arith.constant 0 : index
    %c0_0 = arith.constant 0 : index
    %0 = vector.load %arg2[%c0, %c0_0] : memref<208x128xf32, #tpu.memory_space<vmem>>, vector<208x128xf32>
    %c0_1 = arith.constant 0 : index
    %c0_2 = arith.constant 0 : index
    %1 = vector.load %arg1[%c0_1, %c0_2] : memref<8x128xf32, #tpu.memory_space<vmem>>, vector<8x128xf32>
    %cst = arith.constant dense<0.000000e+00> : vector<208x8xf32>
    %2 = tpu.matmul %0, %1, %cst {dimension_numbers = #tpu.dot_dimension_numbers<[1], [1], [0], [0], [0, 0, 1, 0], [], []>} : vector<208x128xf32>, vector<8x128xf32>, vector<208x8xf32> -> vector<208x8xf32>
    %3 = vector.extract_strided_slice %2 {offsets = [0, 0], sizes = [16, 8], strides = [1, 1]} : vector<208x8xf32> to vector<16x8xf32>
    %c0_3 = arith.constant 0 : index
    %c0_4 = arith.constant 0 : index
    %4 = memref.load %arg3[%c0_3, %c0_4] : memref<1x1xf32, #tpu.memory_space<smem>>
    %5 = vector.broadcast %4 : f32 to vector<16x8xf32>
    %6 = arith.addf %3, %5 : vector<16x8xf32>
    %7 = vector.extract_strided_slice %2 {offsets = [16, 0], sizes = [16, 8], strides = [1, 1]} : vector<208x8xf32> to vector<16x8xf32>
    %8 = arith.mulf %7, %7 : vector<16x8xf32>
    %9 = arith.addf %6, %8 : vector<16x8xf32>
    %10 = vector.extract_strided_slice %2 {offsets = [32, 0], sizes = [16, 8], strides = [1, 1]} : vector<208x8xf32> to vector<16x8xf32>
    %11 = arith.mulf %10, %10 : vector<16x8xf32>
    %12 = arith.addf %9, %11 : vector<16x8xf32>
    %13 = vector.extract_strided_slice %2 {offsets = [48, 0], sizes = [16, 8], strides = [1, 1]} : vector<208x8xf32> to vector<16x8xf32>
    %14 = arith.mulf %13, %13 : vector<16x8xf32>
    %15 = arith.addf %12, %14 : vector<16x8xf32>
    %16 = vector.extract_strided_slice %2 {offsets = [64, 0], sizes = [16, 8], strides = [1, 1]} : vector<208x8xf32> to vector<16x8xf32>
    %17 = arith.mulf %16, %16 : vector<16x8xf32>
    %18 = arith.addf %15, %17 : vector<16x8xf32>
    %19 = vector.extract_strided_slice %2 {offsets = [80, 0], sizes = [16, 8], strides = [1, 1]} : vector<208x8xf32> to vector<16x8xf32>
    %20 = arith.mulf %19, %19 : vector<16x8xf32>
    %21 = arith.subf %18, %20 : vector<16x8xf32>
    %22 = vector.extract_strided_slice %2 {offsets = [96, 0], sizes = [16, 8], strides = [1, 1]} : vector<208x8xf32> to vector<16x8xf32>
    %23 = arith.mulf %22, %22 : vector<16x8xf32>
    %24 = arith.subf %21, %23 : vector<16x8xf32>
    %25 = vector.extract_strided_slice %2 {offsets = [112, 0], sizes = [16, 8], strides = [1, 1]} : vector<208x8xf32> to vector<16x8xf32>
    %26 = arith.mulf %25, %25 : vector<16x8xf32>
    %27 = arith.subf %24, %26 : vector<16x8xf32>
    %28 = vector.extract_strided_slice %2 {offsets = [128, 0], sizes = [16, 8], strides = [1, 1]} : vector<208x8xf32> to vector<16x8xf32>
    %29 = arith.mulf %28, %28 : vector<16x8xf32>
    %30 = arith.subf %27, %29 : vector<16x8xf32>
    %31 = vector.extract_strided_slice %2 {offsets = [144, 0], sizes = [16, 8], strides = [1, 1]} : vector<208x8xf32> to vector<16x8xf32>
    %32 = arith.mulf %31, %31 : vector<16x8xf32>
    %33 = arith.subf %30, %32 : vector<16x8xf32>
    %34 = vector.extract_strided_slice %2 {offsets = [160, 0], sizes = [16, 8], strides = [1, 1]} : vector<208x8xf32> to vector<16x8xf32>
    %35 = arith.mulf %34, %34 : vector<16x8xf32>
    %36 = arith.subf %33, %35 : vector<16x8xf32>
    %37 = vector.extract_strided_slice %2 {offsets = [176, 0], sizes = [16, 8], strides = [1, 1]} : vector<208x8xf32> to vector<16x8xf32>
    %38 = arith.mulf %37, %37 : vector<16x8xf32>
    %39 = arith.subf %36, %38 : vector<16x8xf32>
    %40 = vector.extract_strided_slice %2 {offsets = [192, 0], sizes = [16, 8], strides = [1, 1]} : vector<208x8xf32> to vector<16x8xf32>
    %41 = arith.mulf %40, %40 : vector<16x8xf32>
    %42 = arith.subf %39, %41 : vector<16x8xf32>
    %43 = arith.negf %42 : vector<16x8xf32>
    %44 = math.exp %43 : vector<16x8xf32>
    %cst_5 = arith.constant 1.000000e+00 : f32
    %45 = vector.broadcast %cst_5 : f32 to vector<16x8xf32>
    %46 = arith.addf %45, %44 : vector<16x8xf32>
    %47 = arith.divf %45, %46 : vector<16x8xf32>
    %c0_6 = arith.constant 0 : index
    %c0_7 = arith.constant 0 : index
    %c0_8 = arith.constant 0 : index
    %48 = vector.load %arg4[%c0_6, %c0_7, %c0_8] : memref<1x16x8xf32, #tpu.memory_space<vmem>>, vector<1x16x8xf32>
    %49 = vector.shape_cast %48 : vector<1x16x8xf32> to vector<16x8xf32>
    %50 = vector.shape_cast %47 : vector<16x8xf32> to vector<1x16x8xf32>
    tpu.vector_store %arg4[%c0_6, %c0_7, %c0_8], %50 {strides = array<i32>} : memref<1x16x8xf32, #tpu.memory_space<vmem>>, vector<1x16x8xf32>,
    return
  }
  func.func @transform_0(%arg0: i32) -> (i32, i32) {
    %c0_i32 = arith.constant 0 : i32
    %c0_i32_0 = arith.constant 0 : i32
    return %arg0, %c0_i32 : i32, i32
  }
  func.func @transform_1(%arg0: i32) -> (i32, i32) {
    %c0_i32 = arith.constant 0 : i32
    %c0_i32_0 = arith.constant 0 : i32
    %c0_i32_1 = arith.constant 0 : i32
    return %c0_i32, %c0_i32_0 : i32, i32
  }
  func.func @transform_2(%arg0: i32) -> (i32, i32) {
    %c0_i32 = arith.constant 0 : i32
    %c0_i32_0 = arith.constant 0 : i32
    %c0_i32_1 = arith.constant 0 : i32
    return %c0_i32, %c0_i32_0 : i32, i32
  }
  func.func @transform_3(%arg0: i32) -> (i32, i32, i32) {
    %c0_i32 = arith.constant 0 : i32
    %c0_i32_0 = arith.constant 0 : i32
    %c0_i32_1 = arith.constant 0 : i32
    return %arg0, %c0_i32, %c0_i32_0 : i32, i32, i32
  }
}

</mosaic_0001>

<bundles_post_ra>
// kernel: tpu_custom_call.1
= control target key start
LH: loop header
LB: loop body
LE: loop exit
PB: predicated region body
PF: predicated region fallthrough
CT: control target
= control target key end

     0   :  { %9 = vsyncpa [#allocation4], 0  ;;  %s376_s0 = inlined_call_operand.hbm [shape: f32[8,128], index: 0, kind: input, shape index: {}]   ;;  %s377_s1 = inlined_call_operand.hbm [shape: f32[208,128], index: 1, kind: input, shape index: {}]   ;;  %s378_s2 = inlined_call_operand.<no memory space> [shape: f32[1,1], index: 2, kind: input, shape index: {}]   ;;  %s379_s3 = inlined_call_operand.vmem [shape: f32[1,16,8], index: 3, kind: output, shape index: {}]  }
   0x1   :  { %s16_s14 = sshll.u32 %s376_s0, 4  ;;  %s17_s14 = int_to_ptr.hbm [resolvable:$true] %s16_s14 }
   0x2   :  { %10 = vsyncpa [#allocation6], 0  ;;  %s335_s15 = smov [#allocation3]   ;;  %s26_s19 = sshll.u32 %s377_s1, 4  ;;  %s27_s19 = int_to_ptr.hbm [resolvable:$true] %s26_s19 }
   0x3   :  { %s18_s16 = sshll.u32 %s335_s15, 4  ;;  %s336_s20 = smov [#allocation5]   ;;  %s19_s16 = int_to_ptr.vmem [resolvable:$true] %s18_s16 }
   0x4   :  { %21 = dma.hbm_to_vmem [thread:$0]  %s17_s14, 128, %s19_s16, [#allocation4]  }
   0x5   :  { %s28_s21 = sshll.u32 %s336_s20, 4  ;;  %s337_s22 = smov 128   ;;  %s29_s21 = int_to_ptr.vmem [resolvable:$true] %s28_s21 }
   0x6   :  { %s338_s23 = smov 8  }
   0x7   :  { %34 = dma.hbm_to_vmem [thread:$0]  %s27_s19, 3328, %s29_s21, [#allocation6], %s337_s22, %s337_s22, %s338_s23  }
   0x8   :  { %331 = dma.done.wait [#allocation4], 128  }
   0x9   :  { %332 = vsyncadd [#allocation4], 4294967168 }
   0xa   :  { %333 = dma.done.wait [#allocation6], 3328  }
   0xb   :  { %334 = vsyncadd [#allocation6], 4294963968  ;;  %v71_v0 = vld [vmem:[#allocation3] sm:$0xff]  ;;  %v45_v1 = vld [vmem:[#allocation5] sm:$0xff]  ;;  %v168_v45 = vstv %s378_s2  ;;  %vm257_vm3 = vcmask 64512  }
   0xc   :  { %87 = vmatpush.xpose.msra.mxu0 %v71_v0  ;;  %268 = vmatpush.xpose.msra.mxu1 %v71_v0  ;;  %v52_v2 = vld [vmem:[#allocation5 + $0x38] sm:$0xff]  ;;  %v59_v3 = vld [vmem:[#allocation5 + $0x70] sm:$0xff]  ;;  %v66_v4 = vld [vmem:[#allocation5 + $0xa8] sm:$0xff] }
   0xd   :  { %269 = vmatpush.xpose.msra.mxu2 %v71_v0  ;;  %270 = vmatpush.xpose.msra.mxu3 %v71_v0  ;;  %v46_v5 = vld [vmem:[#allocation5 + $0x8] sm:$0xff]  ;;  %v53_v6 = vld [vmem:[#allocation5 + $0x40] sm:$0xff]  ;;  %v60_v7 = vld [vmem:[#allocation5 + $0x78] sm:$0xff] }
   0xe   :  { %v67_v8 = vld [vmem:[#allocation5 + $0xb0] sm:$0xff]  ;;  %v54_v10 = vld [vmem:[#allocation5 + $0x48] sm:$0xff]  ;;  %v61_v11 = vld [vmem:[#allocation5 + $0x80] sm:$0xff] }
   0xf   :  { %88 = vmatmul.f32.vlgmr.msra.gmra.mxu0 %v45_v1  ;;  %109 = vmatmul.f32.vlgmr.msra.gmra.mxu1 %v52_v2  ;;  %v47_v9 = vld [vmem:[#allocation5 + $0x10] sm:$0xff]  ;;  %v68_v12 = vld [vmem:[#allocation5 + $0xb8] sm:$0xff]  ;;  %v62_v15 = vld [vmem:[#allocation5 + $0x88] sm:$0xff] }
  0x10   :  { %130 = vmatmul.f32.vlgmr.msra.gmra.mxu2 %v59_v3  ;;  %151 = vmatmul.f32.vlgmr.msra.gmra.mxu3 %v66_v4  ;;  %v48_v13 = vld [vmem:[#allocation5 + $0x18] sm:$0xff]  ;;  %v55_v14 = vld [vmem:[#allocation5 + $0x50] sm:$0xff]  ;;  %v69_v16 = vld [vmem:[#allocation5 + $0xc0] sm:$0xff] }
  0x11   :  { %v49_v17 = vld [vmem:[#allocation5 + $0x20] sm:$0xff]  ;;  %v56_v18 = vld [vmem:[#allocation5 + $0x58] sm:$0xff]  ;;  %v63_v19 = vld [vmem:[#allocation5 + $0x90] sm:$0xff] }
  0x12   :  { %v70_v20 = vld [vmem:[#allocation5 + $0xc8] sm:$0xff]  ;;  %v57_v22 = vld [vmem:[#allocation5 + $0x60] sm:$0xff]  ;;  %v64_v23 = vld [vmem:[#allocation5 + $0x98] sm:$0xff] }
  0x13   :  { %v50_v21 = vld [vmem:[#allocation5 + $0x28] sm:$0xff]  ;;  %v51_v24 = vld [vmem:[#allocation5 + $0x30] sm:$0xff]  ;;  %v65_v26 = vld [vmem:[#allocation5 + $0xa0] sm:$0xff] }
  0x14   :  { %v58_v25 = vld [vmem:[#allocation5 + $0x68] sm:$0xff] }
  0x17   :  { %91 = vmatmul.f32.gmra.mxu0 %v46_v5  ;;  %112 = vmatmul.f32.gmra.mxu1 %v53_v6 }
  0x18   :  { %133 = vmatmul.f32.gmra.mxu2 %v60_v7  ;;  %154 = vmatmul.f32.gmra.mxu3 %v67_v8 }
  0x1f   :  { %94 = vmatmul.f32.gmra.mxu0 %v47_v9  ;;  %115 = vmatmul.f32.gmra.mxu1 %v54_v10 }
  0x20   :  { %136 = vmatmul.f32.gmra.mxu2 %v61_v11  ;;  %157 = vmatmul.f32.gmra.mxu3 %v68_v12 }
  0x27   :  { %97 = vmatmul.f32.gmra.mxu0 %v48_v13  ;;  %118 = vmatmul.f32.gmra.mxu1 %v55_v14 }
  0x28   :  { %139 = vmatmul.f32.gmra.mxu2 %v62_v15  ;;  %160 = vmatmul.f32.gmra.mxu3 %v69_v16 }
  0x2f   :  { %100 = vmatmul.f32.gmra.mxu0 %v49_v17  ;;  %121 = vmatmul.f32.gmra.mxu1 %v56_v18 }
  0x30   :  { %142 = vmatmul.f32.gmra.mxu2 %v63_v19  ;;  %163 = vmatmul.f32.gmra.mxu3 %v70_v20 }
  0x37   :  { %103 = vmatmul.f32.gmra.mxu0 %v50_v21  ;;  %124 = vmatmul.f32.gmra.mxu1 %v57_v22 }
  0x38   :  { %145 = vmatmul.f32.gmra.mxu2 %v64_v23 }
  0x3f   :  { %106 = vmatmul.f32.gmra.mxu0 %v51_v24  ;;  %127 = vmatmul.f32.gmra.mxu1 %v58_v25 }
  0x40   :  { %148 = vmatmul.f32.gmra.mxu2 %v65_v26 }
  0x8c   :  { %v89_v27 = vpop.f32.mrf.mxu0  ;;  %v110_v28 = vpop.f32.mrf.mxu1 }
  0x8d   :  { %v180_v52 = vmul.f32 %v110_v28, %v110_v28  ;;  %v169_v55 = vadd.f32 %v168_v45, %v89_v27 }
  0x93   :  { %v131_v29 = vpop.f32.mrf.mxu2  ;;  %v152_v33 = vpop.f32.mrf.mxu3 }
  0x94   :  { %v92_v30 = vpop.f32.mrf.mxu0  ;;  %v113_v31 = vpop.f32.mrf.mxu1  ;;  %v195_v19 = vmul.f32 %v131_v29, %v131_v29  ;;  %v208_v20 = vmul.f32 %v152_v33, %v152_v33 }
  0x95   :  { %v170_v46 = vadd.f32 %v168_v45, %v92_v30  ;;  %v183_v6 = vmul.f32 %v113_v31, %v113_v31 }
  0x9b   :  { %v134_v32 = vpop.f32.mrf.mxu2  ;;  %v155_v39 = vpop.f32.mrf.mxu3 }
  0x9c   :  { %v95_v34 = vpop.f32.mrf.mxu0  ;;  %v116_v35 = vpop.f32.mrf.mxu1  ;;  %v196_v7 = vmul.f32 %v134_v32, %v134_v32 }
  0x9d   :  { %v171_v53 = vmul.f32 %v95_v34, %v95_v34  ;;  %v184_v56 = vmul.f32 %v116_v35, %v116_v35 }
  0x9f   :  { %v173_v60 = vadd.f32 %v171_v53, %v169_v55 }
  0xa3   :  { %v137_v36 = vpop.f32.mrf.mxu2  ;;  %v158_v43 = vpop.f32.mrf.mxu3 }
  0xa4   :  { %v98_v37 = vpop.f32.mrf.mxu0  ;;  %v119_v38 = vpop.f32.mrf.mxu1  ;;  %v199_v23 = vmul.f32 %v137_v36, %v137_v36  ;;  %v212_v25 = vmul.f32 %v158_v43, %v158_v43 }
  0xa5   :  { %v172_v44 = vmul.f32 %v98_v37, %v98_v37  ;;  %v187_v10 = vmul.f32 %v119_v38, %v119_v38  ;;  %v211_v38 = vmul.f32 %v155_v39, %v155_v39 }
  0xa7   :  { %v174_v50 = vadd.f32 %v172_v44, %v170_v46 }
  0xab   :  { %v140_v40 = vpop.f32.mrf.mxu2  ;;  %v161_v59 = vpop.f32.mrf.mxu3 }
  0xac   :  { %v101_v41 = vpop.f32.mrf.mxu0  ;;  %v122_v42 = vpop.f32.mrf.mxu1  ;;  %v200_v11 = vmul.f32 %v140_v40, %v140_v40 }
  0xad   :  { %v175_v57 = vmul.f32 %v101_v41, %v101_v41  ;;  %v188_v61 = vmul.f32 %v122_v42, %v122_v42  ;;  %v215_v42 = vmul.f32 %v161_v59, %v161_v59 }
  0xaf   :  { %v177_v2 = vadd.f32 %v175_v57, %v173_v60 }
  0xb3   :  { %v143_v47 = vpop.f32.mrf.mxu2  ;;  %v164_v18 = vpop.f32.mrf.mxu3 }
  0xb4   :  { %v104_v48 = vpop.f32.mrf.mxu0  ;;  %v125_v49 = vpop.f32.mrf.mxu1  ;;  %v216_v27 = vmul.f32 %v164_v18, %v164_v18  ;;  %v203_v30 = vmul.f32 %v143_v47, %v143_v47 }
  0xb5   :  { %v176_v51 = vmul.f32 %v104_v48, %v104_v48  ;;  %v191_v15 = vmul.f32 %v125_v49, %v125_v49 }
  0xb7   :  { %v178_v54 = vadd.f32 %v176_v51, %v174_v50 }
  0xb9   :  { %v182_v58 = vadd.f32 %v180_v52, %v178_v54 }
  0xbb   :  { %v186_v62 = vadd.f32 %v184_v56, %v182_v58  ;;  %v146_v63 = vpop.f32.mrf.mxu2 }
  0xbc   :  { %v107_v0 = vpop.f32.mrf.mxu0  ;;  %v128_v1 = vpop.f32.mrf.mxu1  ;;  %v204_v14 = vmul.f32 %v146_v63, %v146_v63 }
  0xbd   :  { %v179_v3 = vmul.f32 %v107_v0, %v107_v0  ;;  %v190_v4 = vsub.f32 %v186_v62, %v188_v61  ;;  %v192_v5 = vmul.f32 %v128_v1, %v128_v1 }
  0xbf   :  { %v181_v8 = vadd.f32 %v179_v3, %v177_v2  ;;  %v194_v9 = vsub.f32 %v190_v4, %v192_v5 }
  0xc1   :  { %v185_v12 = vadd.f32 %v183_v6, %v181_v8  ;;  %v198_v13 = vsub.f32 %v194_v9, %v196_v7 }
  0xc3   :  { %v189_v16 = vsub.f32 %v185_v12, %v187_v10  ;;  %v202_v17 = vsub.f32 %v198_v13, %v200_v11  ;;  %v149_v24 = vpop.f32.mrf.mxu2 }
  0xc4   :  { %v207_v34 = vmul.f32 %v149_v24, %v149_v24 }
  0xc5   :  { %v193_v21 = vsub.f32 %v189_v16, %v191_v15  ;;  %v206_v22 = vsub.f32 %v202_v17, %v204_v14 }
  0xc7   :  { %v210_v26 = vsub.f32 %v206_v22, %v208_v20  ;;  %v197_v28 = vsub.f32 %v193_v21, %v195_v19 }
  0xc9   :  { %v214_v31 = vsub.f32 %v210_v26, %v212_v25  ;;  %v201_v32 = vsub.f32 %v197_v28, %v199_v23 }
  0xcb   :  { %v218_v35 = vsub.f32 %v214_v31, %v216_v27  ;;  %v205_v37 = vsub.f32 %v201_v32, %v203_v30 }
  0xcd   :  { %v267_v40 = vmul.f32 -1.442695, %v218_v35  ;;  %v209_v41 = vsub.f32 %v205_v37, %v207_v34 }
  0xcf   :  { %275 = vpow2.f32 %v267_v40  ;;  %v213_v29 = vsub.f32 %v209_v41, %v211_v38 }
  0xd1   :  { %v217_v33 = vsub.f32 %v213_v29, %v215_v42 }
  0xd3   :  { %v266_v44 = vmul.f32 -1.442695, %v217_v33 }
  0xd5   :  { %v276_v36 = vpop.eup %275  ;;  %277 = vpow2.f32 %v266_v44 }
  0xd6   :  { %v226_v43 = vadd.f32 1.0, %v276_v36 }
  0xd8   :  { %279 = vrcp.f32 %v226_v43  ;;  %v253_v50 = vand.u32 2147483648, %v226_v43  ;;  %v251_v39 = vand.u32 2147483647, %v226_v43  ;;  %vm247_vm1 = vweird.f32 %v226_v43 }
  0xda   :  { %v254_v55 = vor.u32 1.1754944e-38, %v253_v50  ;;  %vm252_vm4 = vcmp.eq.f32.partialorder %v251_v39, 8.507059e+37 }
  0xdb   :  { %v278_v45 = vpop.eup %277 }
  0xdc   :  { %v225_v46 = vadd.f32 1.0, %v278_v45 }
  0xde   :  { %v280_v47 = vpop.eup %279  ;;  %281 = vrcp.f32 %v225_v46  ;;  %v238_v59 = vand.u32 2147483648, %v225_v46  ;;  %v236_v61 = vand.u32 2147483647, %v225_v46  ;;  %vm232_vm6 = vweird.f32 %v225_v46 }
  0xdf   :  { %v243_v48 = vmul.f32 %v280_v47, %v226_v43  ;;  %vm248_vm0 = vweird.f32 %v280_v47 }
  0xe0   :  { %vm249_vm2 = vmor %vm247_vm1, %vm248_vm0  ;;  %v239_v63 = vor.u32 1.1754944e-38, %v238_v59  ;;  %vm237_vm8 = vcmp.eq.f32.partialorder %v236_v61, 8.507059e+37 }
  0xe1   :  { %v244_v49 = vsub.f32 1.0, %v243_v48 }
  0xe3   :  { %v245_v51 = vmul.f32 %v280_v47, %v244_v49 }
  0xe4   :  { %v282_v52 = vpop.eup %281 }
  0xe5   :  { %v246_v53 = vadd.f32 %v280_v47, %v245_v51  ;;  %v228_v54 = vmul.f32 %v282_v52, %v225_v46  ;;  %vm233_vm5 = vweird.f32 %v282_v52 }
  0xe6   :  { %vm234_vm7 = vmor %vm232_vm6, %vm233_vm5 }
  0xe7   :  { %v250_v56 = vsel %vm249_vm2, %v280_v47, %v246_v53  ;;  %v229_v57 = vsub.f32 1.0, %v228_v54 }
  0xe8   :  { %v255_v58 = vsel %vm252_vm4, %v254_v55, %v250_v56 }
  0xe9   :  { %259 = vst.msk [vmem:[%s379_s3 + $0x8] sm:$0xff] %vm257_vm3, %v255_v58  ;;  %v230_v60 = vmul.f32 %v282_v52, %v229_v57 }
  0xeb   :  { %v231_v62 = vadd.f32 %v282_v52, %v230_v60 }
  0xed   :  { %v235_v0 = vsel %vm234_vm7, %v282_v52, %v231_v62 }
  0xee   :  { %v240_v1 = vsel %vm237_vm8, %v239_v63, %v235_v0 }
  0xef   :  { %258 = vst.msk [vmem:[%s379_s3] sm:$0xff] %vm257_vm3, %v240_v1 }
  0xf0   :  { %264 = vsyncpa [#allocation4], 1 }
  0xf1   :  { %265 = vsyncpa [#allocation6], 1 }

</bundles_post_ra>
